<compile_context>
chip_gen: v7x
topology: tpu7x:2x2x1
jax: 0.10.0
libtpu: 0.0.40
codegen_flags: <defaults>
</compile_context>

<pallas_src>
import functools

import jax
import jax.numpy as jnp
from jax.experimental import pallas as pl
from jax.experimental.pallas import tpu as pltpu

LANE = 128
TM = 512                 # dst-row tile (sublane axis); v7x can push to 1024
TK = 1024                # src / K tile (lane axis): >=512 lanes ~ HBM roofline
TRANSFORM_TM = 128       # row tile for the tiny dense X @ W transform
RESIDENT_M_BYTES = 8 * 1024 * 1024   # keep RHS M VMEM-resident below this


# ------------------------------ helpers ------------------------------------ #
def _round_up(x, m):
    return (x + m - 1) // m * m


def _pad2d(x, rows, cols):
    r, c = x.shape
    return jnp.pad(x, ((0, rows - r), (0, cols - c)))


def _vmem_limit_bytes():
    """Generation-aware scoped-VMEM budget (leave ~25% headroom for Mosaic)."""
    cap = 64 * 1024 * 1024                     # conservative fallback
    try:
        cap = int(getattr(pltpu.get_tpu_info(), "vmem_capacity_bytes", cap))
    except Exception:
        pass
    return max(32 * 1024 * 1024, (cap * 3) // 4)


def _row_tiling(n):
    """Pad rows to a multiple of the row tile; keep >=2 tiles when possible."""
    tm = min(TM, _round_up(n, 8))
    n_pad = _round_up(n, tm)
    if n_pad // tm < 2 and tm > 8:             # feed both v7x TensorCores
        tm = _round_up(tm // 2, 8)
        n_pad = _round_up(n, tm)
    return n_pad, tm


def _col_tiling(n):
    tk = min(TK, _round_up(n, LANE))
    n_pad = _round_up(n, tk)
    return n_pad, tk


# --------------------------- Pallas kernels --------------------------------- #
def _transform_kernel(x_ref, w_ref, m_ref):
    """M = X @ W (bf16 inputs, f32 MXU accumulation, bf16 output)."""
    m_ref[...] = jnp.dot(x_ref[...], w_ref[...],
                         preferred_element_type=jnp.float32).astype(jnp.bfloat16)


def _prop1_fused_kernel(a_ref, m_ref, b_ref, w2_ref, o_ref, acc_ref, *,
                        tk, m_resident):
    """M2[row tile] = relu(sum_k A_hat[row,k] @ M1[k] + b1).bf16 @ W2."""
    k = pl.program_id(1)

    @pl.when(k == 0)
    def _():
        acc_ref[...] = jnp.zeros_like(acc_ref)

    if m_resident:
        m = m_ref[pl.ds(pl.multiple_of(k * tk, tk), tk), :]
    else:
        m = m_ref[...]
    acc_ref[...] += jnp.dot(a_ref[...], m, preferred_element_type=jnp.float32)

    @pl.when(k == pl.num_programs(1) - 1)
    def _():
        # Bias + relu also hit padded (all-zero) rows; those rows hold junk but
        # are multiplied by all-zero A_hat columns in layer 2, so they're inert.
        h1 = jnp.maximum(acc_ref[...] + b_ref[...], 0.0).astype(jnp.bfloat16)
        o_ref[...] = jnp.dot(h1, w2_ref[...],
                             preferred_element_type=jnp.float32
                             ).astype(jnp.bfloat16)


def _prop2_kernel(a_ref, m_ref, b_ref, o_ref, *, tk, m_resident):
    """OUT[row tile] = sum_k A_hat[row,k] @ M2[k] + b2 (accumulate in o_ref)."""
    k = pl.program_id(1)

    @pl.when(k == 0)
    def _():
        o_ref[...] = jnp.zeros_like(o_ref)

    if m_resident:
        m = m_ref[pl.ds(pl.multiple_of(k * tk, tk), tk), :]
    else:
        m = m_ref[...]
    o_ref[...] += jnp.dot(a_ref[...], m, preferred_element_type=jnp.float32)

    @pl.when(k == pl.num_programs(1) - 1)
    def _():
        o_ref[...] += b_ref[...]


# ------------------------------ wrappers ------------------------------------ #
def _transform(x_p, w_p, vmem_limit):
    n_rows, f_in = x_p.shape                   # n_rows is a multiple of 128
    f_out = w_p.shape[1]
    tm = min(TRANSFORM_TM, n_rows)
    return pl.pallas_call(
        _transform_kernel,
        out_shape=jax.ShapeDtypeStruct((n_rows, f_out), jnp.bfloat16),
        grid_spec=pltpu.PrefetchScalarGridSpec(
            num_scalar_prefetch=0,
            grid=(n_rows // tm,),
            in_specs=[pl.BlockSpec((tm, f_in), lambda i: (i, 0)),
                      pl.BlockSpec((f_in, f_out), lambda i: (0, 0))],
            out_specs=pl.BlockSpec((tm, f_out), lambda i: (i, 0))),
        compiler_params=pltpu.CompilerParams(
            dimension_semantics=("parallel",),
            vmem_limit_bytes=vmem_limit),
    )(x_p, w_p)


def _propagate(a_p, m_p, b_p, w2_p, *, tm, tk, vmem_limit):
    """A_hat sweep; fuses the layer-2 transform when w2_p is not None."""
    n_rows_pad, n_cols_pad = a_p.shape
    f = m_p.shape[1]
    grid = (n_rows_pad // tm, n_cols_pad // tk)

    m_resident = (m_p.size * m_p.dtype.itemsize) <= RESIDENT_M_BYTES
    if m_resident:
        # Full-array block, constant index -> DMA'd once, VMEM-resident; the
        # kernel slices the active (tk, f) chunk with pl.ds.
        m_spec = pl.BlockSpec((n_cols_pad, f), lambda i, k: (0, 0))
    else:
        m_spec = pl.BlockSpec((tk, f), lambda i, k: (k, 0))

    cp = pltpu.CompilerParams(dimension_semantics=("parallel", "arbitrary"),
                              vmem_limit_bytes=vmem_limit)

    if w2_p is not None:
        f2 = w2_p.shape[1]
        kernel = functools.partial(_prop1_fused_kernel, tk=tk,
                                   m_resident=m_resident)
        return pl.pallas_call(
            kernel,
            out_shape=jax.ShapeDtypeStruct((n_rows_pad, f2), jnp.bfloat16),
            grid_spec=pltpu.PrefetchScalarGridSpec(
                num_scalar_prefetch=0,
                grid=grid,
                in_specs=[pl.BlockSpec((tm, tk), lambda i, k: (i, k)),
                          m_spec,
                          pl.BlockSpec((1, f), lambda i, k: (0, 0)),
                          pl.BlockSpec((f, f2), lambda i, k: (0, 0))],
                out_specs=pl.BlockSpec((tm, f2), lambda i, k: (i, 0)),
                scratch_shapes=[pltpu.VMEM((tm, f), jnp.float32)]),
            compiler_params=cp,
        )(a_p, m_p, b_p, w2_p)

    kernel = functools.partial(_prop2_kernel, tk=tk, m_resident=m_resident)
    return pl.pallas_call(
        kernel,
        out_shape=jax.ShapeDtypeStruct((n_rows_pad, f), jnp.float32),
        grid_spec=pltpu.PrefetchScalarGridSpec(
            num_scalar_prefetch=0,
            grid=grid,
            in_specs=[pl.BlockSpec((tm, tk), lambda i, k: (i, k)),
                      m_spec,
                      pl.BlockSpec((1, f), lambda i, k: (0, 0))],
            out_specs=pl.BlockSpec((tm, f), lambda i, k: (i, 0))),
        compiler_params=cp,
    )(a_p, m_p, b_p)


def gnn_forward(a_hat, x, w1, b1, w2, b2):
    """relu(A_hat @ (X @ W1) + b1) -> A_hat @ (. @ W2) + b2 (all in Pallas)."""
    n, f_in = x.shape
    h = w1.shape[1]
    f_out = w2.shape[1]

    vmem_limit = _vmem_limit_bytes()
    n_rows_pad, tm = _row_tiling(n)            # dst-node padding
    n_cols_pad, tk = _col_tiling(n)            # src-node padding (independent)

    f_in_p = _round_up(f_in, LANE)
    h_p = _round_up(h, LANE)
    f_out_p = _round_up(f_out, LANE)

    # Cast to bf16 BEFORE padding so XLA never materializes padded f32 copies.
    a_p = _pad2d(a_hat.astype(jnp.bfloat16), n_rows_pad, n_cols_pad)
    x_p = _pad2d(x.astype(jnp.bfloat16), n_cols_pad, f_in_p)
    w1_p = _pad2d(w1.astype(jnp.bfloat16), f_in_p, h_p)
    w2_p = _pad2d(w2.astype(jnp.bfloat16), h_p, f_out_p)
    b1_p = _pad2d(b1.reshape(1, -1).astype(jnp.float32), 1, h_p)
    b2_p = _pad2d(b2.reshape(1, -1).astype(jnp.float32), 1, f_out_p)

    # layer 1 transform: M1 = X @ W1 (bf16)
    m1 = _transform(x_p, w1_p, vmem_limit)
    # layer 1 propagate fused with the layer 2 transform:
    #   M2 = relu(A_hat @ M1 + b1).bf16 @ W2   (no H1 HBM round trip)
    m2 = _propagate(a_p, m1, b1_p, w2_p, tm=tm, tk=tk, vmem_limit=vmem_limit)
    # Re-pad M2 rows (dst padding) to the src/column padding for layer 2.
    if m2.shape[0] < n_cols_pad:
        m2 = jnp.pad(m2, ((0, n_cols_pad - m2.shape[0]), (0, 0)))
    elif m2.shape[0] > n_cols_pad:
        m2 = m2[:n_cols_pad]
    # layer 2 propagate: OUT = A_hat @ M2 + b2 (f32)
    out = _propagate(a_p, m2, b2_p, None, tm=tm, tk=tk, vmem_limit=vmem_limit)
    return out[:n, :f_out]


# ------------------------------- glue (JAX) --------------------------------- #
def build_gcn_adjacency(edge_index, num_nodes):
    """Dense A_hat = D^{-1/2}(A + I)D^{-1/2}, matching PyG gcn_norm.

    edge_index: (2, E) int array, row 0 = src, row 1 = dst.
    Self-loops are only added for nodes that do not already have one
    (add_remaining_self_loops semantics), avoiding double counting.
    """
    src, dst = edge_index[0], edge_index[1]
    a = jnp.zeros((num_nodes, num_nodes), jnp.float32).at[dst, src].add(1.0)
    diag = jnp.diagonal(a)
    idx = jnp.arange(num_nodes)
    a = a.at[idx, idx].set(jnp.where(diag > 0, diag, 1.0))
    deg = a.sum(axis=1)
    dinv = jnp.where(deg > 0, 1.0 / jnp.sqrt(deg), 0.0)
    return dinv[:, None] * a * dinv[None, :]


def _reference(a_hat, x, w1, b1, w2, b2):
    """Plain-JAX mirror of the kernel's bf16/f32 compute path."""
    a_bf = a_hat.astype(jnp.bfloat16)
    m1 = jnp.dot(x.astype(jnp.bfloat16), w1.astype(jnp.bfloat16),
                 preferred_element_type=jnp.float32).astype(jnp.bfloat16)
    h1 = jnp.maximum(
        jnp.dot(a_bf, m1, preferred_element_type=jnp.float32) + b1, 0.0)
    m2 = jnp.dot(h1.astype(jnp.bfloat16), w2.astype(jnp.bfloat16),
                 preferred_element_type=jnp.float32).astype(jnp.bfloat16)
    return jnp.dot(a_bf, m2, preferred_element_type=jnp.float32) + b2


if __name__ == "__main__":
    # Small deterministic graph: 8-node directed ring (each edge stored once,
    # as list(G.edges) would give).
    num_nodes = 8
    edge_src = jnp.arange(num_nodes, dtype=jnp.int32)
    edge_dst = (edge_src + 1) % num_nodes
    edge_index = jnp.stack([edge_src, edge_dst])          # (2, E)

    # data.x = eye(num_nodes)  ->  num_node_features == num_nodes
    x = jnp.eye(num_nodes, dtype=jnp.float32)
    a_hat = build_gcn_adjacency(edge_index, num_nodes)

    # Deterministic parameter init (GCNConv shapes: in -> out, plus bias).
    key = jax.random.PRNGKey(0)
    k1, k2, k3, k4 = jax.random.split(key, 4)
    f_in, hdim, f_out = num_nodes, 16, 32
    w1 = jax.random.normal(k1, (f_in, hdim), jnp.float32) * 0.1
    b1 = jax.random.normal(k2, (1, hdim), jnp.float32) * 0.1
    w2 = jax.random.normal(k3, (hdim, f_out), jnp.float32) * 0.1
    b2 = jax.random.normal(k4, (1, f_out), jnp.float32) * 0.1

    out = gnn_forward(a_hat, x, w1, b1, w2, b2)
    out = jax.block_until_ready(out)
    assert out.shape == (num_nodes, f_out)

    # Tight check vs. a plain-JAX mirror of the same bf16/f32 compute path.
    ref_bf16 = _reference(a_hat, x, w1, b1, w2, b2)
    assert jnp.allclose(out, ref_bf16, atol=1e-4, rtol=1e-4)

    # Loose sanity check vs. the full-f32 GCN reference (bf16 rounding only).
    h1_f32 = jnp.maximum(a_hat @ (x @ w1) + b1, 0.0)
    ref_f32 = a_hat @ (h1_f32 @ w2) + b2
    assert jnp.allclose(out, ref_f32, atol=5e-2, rtol=5e-2)

    print("KERNEL_OK")
</pallas_src>

<mosaic_0001>
module attributes {stable_mosaic.version = 11 : i64} {
  func.func @_transform_kernel(%arg0: i32, %arg1: memref<128x128xbf16, #tpu.memory_space<vmem>>, %arg2: memref<128x128xbf16, #tpu.memory_space<vmem>>, %arg3: memref<128x128xbf16, #tpu.memory_space<vmem>>) attributes {dimension_semantics = [#tpu.dimension_semantics<parallel>], iteration_bounds = array<i64: 1>, scalar_prefetch = 0 : i64, scratch_operands = 0 : i64, tpu.core_type = #tpu.core_type<tc>, window_params = [{transform_indices = @transform_0, window_bounds = array<i64: 128, 128>}, {pipeline_mode = #tpu.pipeline_mode<synchronous>, transform_indices = @transform_1, window_bounds = array<i64: 128, 128>}, {transform_indices = @transform_2, window_bounds = array<i64: 128, 128>}]} {
    %c0 = arith.constant 0 : index
    %c0_0 = arith.constant 0 : index
    %0 = vector.load %arg1[%c0, %c0_0] : memref<128x128xbf16, #tpu.memory_space<vmem>>, vector<128x128xbf16>
    %c0_1 = arith.constant 0 : index
    %c0_2 = arith.constant 0 : index
    %1 = vector.load %arg2[%c0_1, %c0_2] : memref<128x128xbf16, #tpu.memory_space<vmem>>, vector<128x128xbf16>
    %cst = arith.constant dense<0.000000e+00> : vector<128x128xf32>
    %2 = tpu.matmul %0, %1, %cst {dimension_numbers = #tpu.dot_dimension_numbers<[1], [0], [0], [1], [0, 0, 1, 1], [], []>} : vector<128x128xbf16>, vector<128x128xbf16>, vector<128x128xf32> -> vector<128x128xf32>
    %3 = arith.truncf %2 : vector<128x128xf32> to vector<128x128xbf16>
    %c0_3 = arith.constant 0 : index
    %c0_4 = arith.constant 0 : index
    %4 = vector.load %arg3[%c0_3, %c0_4] : memref<128x128xbf16, #tpu.memory_space<vmem>>, vector<128x128xbf16>
    tpu.vector_store %arg3[%c0_3, %c0_4], %3 {strides = array<i32>} : memref<128x128xbf16, #tpu.memory_space<vmem>>, vector<128x128xbf16>,
    return
  }
  func.func @transform_0(%arg0: i32) -> (i32, i32) {
    %c0_i32 = arith.constant 0 : i32
    %c0_i32_0 = arith.constant 0 : i32
    return %arg0, %c0_i32 : i32, i32
  }
  func.func @transform_1(%arg0: i32) -> (i32, i32) {
    %c0_i32 = arith.constant 0 : i32
    %c0_i32_0 = arith.constant 0 : i32
    %c0_i32_1 = arith.constant 0 : i32
    return %c0_i32, %c0_i32_0 : i32, i32
  }
  func.func @transform_2(%arg0: i32) -> (i32, i32) {
    %c0_i32 = arith.constant 0 : i32
    %c0_i32_0 = arith.constant 0 : i32
    return %arg0, %c0_i32 : i32, i32
  }
}

</mosaic_0001>

<bundles_post_ra>
// kernel: tpu_custom_call.1
= control target key start
LH: loop header
LB: loop body
LE: loop exit
PB: predicated region body
PF: predicated region fallthrough
CT: control target
= control target key end

     0   :  { %7 = vsyncpa [#allocation3], 0  ;;  %s681_s0 = inlined_call_operand.hbm [shape: bf16[128,128], index: 0, kind: input, shape index: {}]   ;;  %s682_s1 = inlined_call_operand.hbm [shape: bf16[128,128], index: 1, kind: input, shape index: {}]   ;;  %s683_s2 = inlined_call_operand.hbm [shape: bf16[128,128], index: 2, kind: output, shape index: {}]  }
   0x1   :  { %8 = vsyncpa [#allocation6], 0 }
   0x2   :  { %9 = vsyncpa [#allocation4], 0  ;;  %s616_s9 = smov [#allocation2]   ;;  %s544_s13 = scalar_lea.hbm %s681_s0, 1024 }
   0x3   :  { %s15_s10 = sshll.u32 %s616_s9, 4  ;;  %p545_p0 = scmp.ne.s32.totalorder %s681_s0, %s544_s13  ;;  %s16_s10 = int_to_ptr.vmem [resolvable:$true] %s15_s10 }
   0x4   :  { %p548_p1 = scmp.lt.u32.totalorder %s544_s13, %s681_s0 }
   0x6   :  { %p550_p2 = pnand %p548_p1, %p545_p0 }
   0x8   :  { %553 = shalt.err (!%p550_p2)
}
   0x9   :  { %s554_s18 = scalar_lea.vmem %s16_s10, 1024  ;;  %p559_p4 = scmp.lt.s32.totalorder %s16_s10, %s16_s10 }
   0xa   :  { %p555_p3 = scmp.ne.s32.totalorder %s16_s10, %s554_s18  ;;  %p560_p5 = scmp.lt.s32.totalorder %s554_s18, %s554_s18 }
   0xc   :  { %p561_p6 = por %p560_p5, %p559_p4 }
   0xe   :  { %p562_p7 = pnand %p561_p6, %p555_p3 }
  0x10   :  { %565 = shalt.err (!%p562_p7)
}
  0x11   :  { %s617_s19 = smov 64   ;;  %s618_s20 = smov 4  }
  0x12   :  { %21 = dma.hbm_to_vmem [thread:$0]  %s681_s0, 1024, %s16_s10, [#allocation3], %s617_s19, %s617_s19, %s618_s20  }
  0x13   :  { %s619_s23 = smov [#allocation5]   ;;  %s566_s27 = scalar_lea.hbm %s682_s1, 1024 }
  0x14   :  { %s27_s24 = sshll.u32 %s619_s23, 4  ;;  %p567_p8 = scmp.ne.s32.totalorder %s682_s1, %s566_s27  ;;  %s28_s24 = int_to_ptr.vmem [resolvable:$true] %s27_s24 }
  0x15   :  { %p570_p9 = scmp.lt.u32.totalorder %s566_s27, %s682_s1 }
  0x17   :  { %p572_p10 = pnand %p570_p9, %p567_p8 }
  0x19   :  { %575 = shalt.err (!%p572_p10)
}
  0x1a   :  { %s576_s4 = scalar_lea.vmem %s28_s24, 1024  ;;  %p581_p12 = scmp.lt.s32.totalorder %s28_s24, %s28_s24 }
  0x1b   :  { %p577_p11 = scmp.ne.s32.totalorder %s28_s24, %s576_s4  ;;  %p582_p13 = scmp.lt.s32.totalorder %s576_s4, %s576_s4 }
  0x1d   :  { %p583_p0 = por %p582_p13, %p581_p12 }
  0x1f   :  { %p584_p1 = pnand %p583_p0, %p577_p11 }
  0x21   :  { %587 = shalt.err (!%p584_p1)
}
  0x22   :  { %33 = dma.hbm_to_vmem [thread:$0]  %s682_s1, 1024, %s28_s24, [#allocation6], %s617_s19, %s617_s19, %s618_s20  }
  0x23   :  { %610 = dma.done.wait [#allocation3], 1024  }
  0x24   :  { %611 = vsyncadd [#allocation3], 4294966272 }
  0x25   :  { %612 = dma.done.wait [#allocation6], 1024  }
  0x26   :  { %613 = vsyncadd [#allocation6], 4294966272  ;;  %v528_v0 = vld [vmem:[#allocation5] sm:$0xff]   ;;  %v529_v1 = vld [vmem:[#allocation5 + $0x8] sm:$0xff]   ;;  %s620_s1 = smov [#allocation7]  }
  0x27   :  { %475 = vmatprep.subr.bf16.mxu0 %v528_v0  ;;  %507 = vmatprep.subr.bf16.mxu1 %v528_v0  ;;  %v530_v2 = vld [vmem:[#allocation5 + $0x10] sm:$0xff]   ;;  %v531_v3 = vld [vmem:[#allocation5 + $0x18] sm:$0xff]   ;;  %v536_v4 = vld [vmem:[#allocation2] sm:$0xff]   ;;  %s351_s6 = sshll.u32 %s620_s1, 4  ;;  %s352_s6 = int_to_ptr.vmem [resolvable:$true] %s351_s6 }
  0x28   :  { %476 = vmatpush3.bf16.msra.mxu0 %v528_v0  ;;  %515 = vmatpush3.bf16.msra.mxu1 %v528_v0  ;;  %v537_v5 = vld [vmem:[#allocation2 + $0x20] sm:$0xff]   ;;  %v533_v7 = vld [vmem:[#allocation5 + $0x28] sm:$0xff]   ;;  %v534_v8 = vld [vmem:[#allocation5 + $0x30] sm:$0xff]   ;;  %s588_s7 = scalar_lea.vmem %s352_s6, 1024  ;;  %p593_p3 = scmp.lt.s32.totalorder %s352_s6, %s352_s6 }
  0x29   :  { %477 = vmatprep.subr.bf16.mxu0 %v529_v1  ;;  %508 = vmatprep.subr.bf16.mxu1 %v529_v1  ;;  %v532_v6 = vld [vmem:[#allocation5 + $0x20] sm:$0xff]   ;;  %v535_v9 = vld [vmem:[#allocation5 + $0x38] sm:$0xff]   ;;  %v538_v10 = vld [vmem:[#allocation2 + $0x8] sm:$0xff]   ;;  %p589_p2 = scmp.ne.s32.totalorder %s352_s6, %s588_s7  ;;  %p594_p4 = scmp.lt.s32.totalorder %s588_s7, %s588_s7 }
  0x2a   :  { %491 = vmatprep.mubr.bf16.mxu0 %v536_v4  ;;  %499 = vmatprep.mubr.bf16.mxu1 %v537_v5  ;;  %v539_v11 = vld [vmem:[#allocation2 + $0x28] sm:$0xff]   ;;  %v540_v12 = vld [vmem:[#allocation2 + $0x10] sm:$0xff]   ;;  %v542_v14 = vld [vmem:[#allocation2 + $0x18] sm:$0xff]  }
  0x2b   :  { %v541_v13 = vld [vmem:[#allocation2 + $0x30] sm:$0xff]   ;;  %v543_v15 = vld [vmem:[#allocation2 + $0x38] sm:$0xff]   ;;  %p595_p5 = por %p594_p4, %p593_p3 }
  0x2c   :  { %478 = vmatpush3.bf16.msra.mxu0 %v529_v1  ;;  %516 = vmatpush3.bf16.msra.mxu1 %v529_v1 }
  0x2d   :  { %479 = vmatprep.subr.bf16.mxu0 %v530_v2  ;;  %509 = vmatprep.subr.bf16.mxu1 %v530_v2  ;;  %p596_p6 = pnand %p595_p5, %p589_p2 }
  0x30   :  { %480 = vmatpush3.bf16.msra.mxu0 %v530_v2  ;;  %517 = vmatpush3.bf16.msra.mxu1 %v530_v2 }
  0x31   :  { %481 = vmatprep.subr.bf16.mxu0 %v531_v3  ;;  %510 = vmatprep.subr.bf16.mxu1 %v531_v3 }
  0x34   :  { %482 = vmatpush3.bf16.msra.mxu0 %v531_v3  ;;  %518 = vmatpush3.bf16.msra.mxu1 %v531_v3 }
  0x35   :  { %483 = vmatprep.subr.bf16.mxu0 %v532_v6  ;;  %511 = vmatprep.subr.bf16.mxu1 %v532_v6 }
  0x38   :  { %484 = vmatpush3.bf16.msra.mxu0 %v532_v6  ;;  %519 = vmatpush3.bf16.msra.mxu1 %v532_v6 }
  0x39   :  { %485 = vmatprep.subr.bf16.mxu0 %v533_v7  ;;  %512 = vmatprep.subr.bf16.mxu1 %v533_v7 }
  0x3c   :  { %486 = vmatpush3.bf16.msra.mxu0 %v533_v7  ;;  %520 = vmatpush3.bf16.msra.mxu1 %v533_v7 }
  0x3d   :  { %487 = vmatprep.subr.bf16.mxu0 %v534_v8  ;;  %513 = vmatprep.subr.bf16.mxu1 %v534_v8 }
  0x40   :  { %488 = vmatpush3.bf16.msra.mxu0 %v534_v8  ;;  %521 = vmatpush3.bf16.msra.mxu1 %v534_v8 }
  0x41   :  { %489 = vmatprep.subr.bf16.mxu0 %v535_v9  ;;  %514 = vmatprep.subr.bf16.mxu1 %v535_v9 }
  0x44   :  { %490 = vmatpush3.bf16.msra.mxu0 %v535_v9  ;;  %522 = vmatpush3.bf16.msra.mxu1 %v535_v9 }
  0x47   :  { %492 = vmatmul.mubr.bf16.vlgmr.msra.gmra.mrb[0].mxu0 %v538_v10  ;;  %500 = vmatmul.mubr.bf16.vlgmr.msra.gmra.mrb[0].mxu1 %v539_v11 }
  0x48   :  { %495 = vmatprep.mubr.bf16.mxu0 %v540_v12  ;;  %503 = vmatprep.mubr.bf16.mxu1 %v541_v13 }
  0x4f   :  { %496 = vmatmul.mubr.bf16.gmra.mrb[4].mxu0 %v542_v14  ;;  %504 = vmatmul.mubr.bf16.gmra.mrb[4].mxu1 %v543_v15 }
 0x11a   :  { %v493_v16 = vpop.f32.mrb[0].mxu0  ;;  %v501_v17 = vpop.f32.mrb[0].mxu1 }
 0x11b   :  { %v203_v18 = vpop.f32.mrb[1].mxu0  ;;  %v235_v19 = vpop.f32.mrb[1].mxu1 }
 0x11c   :  { %v494_v20 = vpop.f32.mrb[2].mxu0  ;;  %v502_v21 = vpop.f32.mrb[2].mxu1 }
 0x11d   :  { %v420_v22 = vpack.c.bf16 %v494_v20, %v493_v16  ;;  %v440_v23 = vpack.c.bf16 %v502_v21, %v501_v17  ;;  %v206_v24 = vpop.f32.mrb[3].mxu0  ;;  %v238_v25 = vpop.f32.mrb[3].mxu1 }
 0x11e   :  { %v415_v26 = vpack.c.bf16 %v206_v24, %v203_v18  ;;  %v435_v27 = vpack.c.bf16 %v238_v25, %v235_v19 }
 0x11f   :  { %452 = vst [vmem:[#allocation7 + $0x8] sm:$0xff] %v420_v22   ;;  %456 = vst [vmem:[#allocation7 + $0x28] sm:$0xff] %v440_v23  }
 0x120   :  { %416 = vst [vmem:[#allocation7] sm:$0xff] %v415_v26   ;;  %455 = vst [vmem:[#allocation7 + $0x20] sm:$0xff] %v435_v27  }
 0x122   :  { %v497_v28 = vpop.f32.mrb[4].mxu0  ;;  %v505_v29 = vpop.f32.mrb[4].mxu1 }
 0x123   :  { %v219_v30 = vpop.f32.mrb[5].mxu0  ;;  %v251_v31 = vpop.f32.mrb[5].mxu1 }
 0x124   :  { %v498_v32 = vpop.f32.mrb[6].mxu0  ;;  %v506_v33 = vpop.f32.mrb[6].mxu1 }
 0x125   :  { %v430_v34 = vpack.c.bf16 %v498_v32, %v497_v28  ;;  %v450_v35 = vpack.c.bf16 %v506_v33, %v505_v29  ;;  %v222_v36 = vpop.f32.mrb[7].mxu0  ;;  %v254_v37 = vpop.f32.mrb[7].mxu1 }
 0x126   :  { %v425_v38 = vpack.c.bf16 %v222_v36, %v219_v30  ;;  %v445_v39 = vpack.c.bf16 %v254_v37, %v251_v31 }
 0x127   :  { %454 = vst [vmem:[#allocation7 + $0x18] sm:$0xff] %v430_v34   ;;  %458 = vst [vmem:[#allocation7 + $0x38] sm:$0xff] %v450_v35  }
 0x128   :  { %453 = vst [vmem:[#allocation7 + $0x10] sm:$0xff] %v425_v38   ;;  %457 = vst [vmem:[#allocation7 + $0x30] sm:$0xff] %v445_v39  }
 0x129   :  { %599 = shalt.err (!%p596_p6)
}
 0x12a   :  { %s600_s10 = scalar_lea.hbm %s683_s2, 1024 }
 0x12b   :  { %p601_p7 = scmp.ne.s32.totalorder %s683_s2, %s600_s10  ;;  %p604_p8 = scmp.lt.u32.totalorder %s600_s10, %s683_s2 }
 0x12d   :  { %p606_p9 = pnand %p604_p8, %p601_p7 }
 0x12f   :  { %609 = shalt.err (!%p606_p9)
}
 0x130   :  { %357 = dma.vmem_to_hbm [thread:$0]  %s352_s6, 1024, %s683_s2, [#allocation4], %s617_s19, %s617_s19, %s618_s20  }
 0x131   :  { %614 = dma.done.wait [#allocation4], 1024  }
 0x132   :  { %615 = vsyncadd [#allocation4], 4294966272 }
 0x133   :  { %361 = vsyncpa [#allocation3], 1 }
 0x134   :  { %362 = vsyncpa [#allocation6], 1 }
 0x135   :  { %363 = vsyncpa [#allocation4], 1 }

</bundles_post_ra>
